<compile_context>
chip_gen: v5e
topology: v5e:2x2
jax: 0.10.0
libtpu: 0.0.40
codegen_flags: <defaults>
</compile_context>

<pallas_src>
import functools

import jax
import jax.numpy as jnp
from jax.experimental import pallas as pl
from jax.experimental.pallas import tpu as pltpu


def _round_up(x: int, m: int) -> int:
    return ((x + m - 1) // m) * m


def _online_contrastive_kernel(
    # scalar-prefetch (SMEM): block-row / block-col ids of each grid step
    blk_i_ref, blk_j_ref,
    # tiled inputs (VMEM)
    emb_i_ref,      # (BM, TK)  row-embedding K-slice, MXU dtype
    embT_j_ref,     # (TK, BM)  pre-transposed col-embedding K-slice, MXU dtype
    sq_i_ref,       # (BM, 1)   f32 squared norms of the row tile
    sq_j_ref,       # (1, BM)   f32 squared norms of the col tile
    lab_i_ref,      # (BM, 1)   int32 labels of the row tile
    lab_j_ref,      # (1, BM)   int32 labels of the col tile
    # output (VMEM)
    out_ref,        # (1, 1, BM) f32 lane-dense per-column partial sums
    # scratch
    acc_ref,        # (BM, BM)  f32 gram accumulator across K steps
    *,
    margin: float,
    num_valid: int,
    block_rows: int,
    num_blocks: int,
    has_padding: bool,
):
    t = pl.program_id(0)
    k = pl.program_id(1)
    nk = pl.num_programs(1)

    @pl.when(k == 0)
    def _():
        acc_ref[...] = jnp.zeros_like(acc_ref)

    # gram[m, n] += <e_i[m], e_j[n]>  — clean (M,K)x(K,N) MXU contraction,
    # f32 accumulation, operands stay in their (possibly bf16) MXU dtype.
    acc_ref[...] += jax.lax.dot_general(
        emb_i_ref[...], embT_j_ref[...],
        (((1,), (0,)), ((), ())),
        preferred_element_type=jnp.float32,
    )

    @pl.when(k == nk - 1)
    def _tail():
        gram = acc_ref[...]

        # pairwise squared distances, clamped for numerical safety
        d2 = jnp.maximum(sq_i_ref[...] + sq_j_ref[...] - 2.0 * gram, 0.0)

        # fused positive / negative contribution:
        #   same label -> d^2 ; different label -> relu(margin - d)^2
        hinge = jnp.maximum(margin - jnp.sqrt(d2), 0.0)      # sqrt on the EUP
        contrib = jnp.where(lab_i_ref[...] == lab_j_ref[...], d2, hinge * hinge)

        bi = blk_i_ref[t]
        bj = blk_j_ref[t]
        # The validity mask is only needed on diagonal blocks (row < col
        # triangular selection) and, when the batch is padded, on the last
        # block column (padded cols). Interior blocks are fully valid.
        if has_padding:
            need_mask = jnp.logical_or(bi == bj, bj == num_blocks - 1)
        else:
            need_mask = bi == bj

        @pl.when(jnp.logical_not(need_mask))
        def _():
            # interior block: no iota / compare / select on the hot path
            out_ref[...] = jnp.sum(
                contrib, axis=0, keepdims=True).reshape(1, 1, block_rows)

        @pl.when(need_mask)
        def _():
            shape = (block_rows, block_rows)
            row_g = bi * block_rows + jax.lax.broadcasted_iota(jnp.int32, shape, 0)
            col_g = bj * block_rows + jax.lax.broadcasted_iota(jnp.int32, shape, 1)
            valid = jnp.logical_and(row_g < col_g, col_g < num_valid)
            out_ref[...] = jnp.sum(
                jnp.where(valid, contrib, 0.0), axis=0, keepdims=True
            ).reshape(1, 1, block_rows)


def online_contrastive_loss(embeddings, labels, margin=1.0, *,
                            block_rows=256, k_block=512, mxu_dtype=None):
    """All-pairs online contrastive loss; the O(B^2 * D) hot path runs in Pallas.

    block_rows: pair-matrix tile edge (384-512 helps on v5e/v6e for modest D).
    k_block:    feature-chunk size for the K grid axis (bounds VMEM for big D).
    mxu_dtype:  optional MXU operand dtype (e.g. jnp.bfloat16) for ~3-4x faster
                gram matmuls; norms and accumulation stay f32.
    """
    B, D = embeddings.shape
    if B < 2:
        raise ValueError("OnlineContrastiveLoss needs at least 2 embeddings.")

    # ---- tile sizing -------------------------------------------------------
    if B <= block_rows:
        bm = _round_up(max(B, 8), 8)      # single block covers the whole batch
        Bp = bm
    else:
        bm = _round_up(block_rows, 128)   # multiple of 128 for clean lane tiling
        Bp = _round_up(B, bm)
    num_blocks = Bp // bm
    has_padding = Bp != B

    Dp_min = _round_up(D, 128)
    kb = max(128, _round_up(k_block, 128))
    num_k = -(-Dp_min // kb)
    tk = _round_up(-(-Dp_min // num_k), 128)
    Dp = tk * num_k

    # ---- operand prep (O(B*D) / O(B), negligible vs the O(B^2*D) kernel) ---
    e_f32 = embeddings.astype(jnp.float32)
    sq = jnp.sum(e_f32 * e_f32, axis=1)                  # exact f32 squared norms

    mm_dtype = embeddings.dtype if mxu_dtype is None else mxu_dtype
    emb_p = jnp.zeros((Bp, Dp), dtype=mm_dtype).at[:B, :D].set(
        embeddings.astype(mm_dtype))
    emb_t = emb_p.T                                      # (Dp, Bp) column operand

    sq_p = jnp.zeros((Bp,), jnp.float32).at[:B].set(sq)
    sq_col = sq_p.reshape(Bp, 1)
    sq_row = sq_p.reshape(1, Bp)

    lab_p = jnp.full((Bp,), -1, dtype=jnp.int32).at[:B].set(labels.astype(jnp.int32))
    lab_col = lab_p.reshape(Bp, 1)
    lab_row = lab_p.reshape(1, Bp)

    # Upper-triangular block enumeration (bj >= bi), fed via scalar prefetch.
    pairs = [(i, j) for i in range(num_blocks) for j in range(i, num_blocks)]
    num_tiles = len(pairs)
    blk_i = jnp.asarray([p[0] for p in pairs], dtype=jnp.int32)
    blk_j = jnp.asarray([p[1] for p in pairs], dtype=jnp.int32)

    kernel = functools.partial(
        _online_contrastive_kernel,
        margin=float(margin), num_valid=B, block_rows=bm,
        num_blocks=num_blocks, has_padding=has_padding)

    grid_spec = pltpu.PrefetchScalarGridSpec(
        num_scalar_prefetch=2,
        grid=(num_tiles, num_k),
        in_specs=[
            pl.BlockSpec((bm, tk), lambda t, k, bi, bj: (bi[t], k)),   # row emb
            pl.BlockSpec((tk, bm), lambda t, k, bi, bj: (k, bj[t])),   # col emb^T
            pl.BlockSpec((bm, 1), lambda t, k, bi, bj: (bi[t], 0)),    # row |e|^2
            pl.BlockSpec((1, bm), lambda t, k, bi, bj: (0, bj[t])),    # col |e|^2
            pl.BlockSpec((bm, 1), lambda t, k, bi, bj: (bi[t], 0)),    # row labels
            pl.BlockSpec((1, bm), lambda t, k, bi, bj: (0, bj[t])),    # col labels
        ],
        out_specs=pl.BlockSpec((1, 1, bm), lambda t, k, bi, bj: (t, 0, 0)),
        scratch_shapes=[pltpu.VMEM((bm, bm), jnp.float32)],
    )

    # VMEM budget from tile sizes; K tiling bounds it independent of D.
    # Clamp to [32, 48] MiB — safe on v5e/v6e (128 MiB) and v7x (64 MiB) alike.
    emb_item = jnp.dtype(mm_dtype).itemsize
    est = (4 * bm * tk * emb_item          # 2 emb operands, double-buffered
           + bm * bm * 4                   # gram accumulator scratch
           + 8 * bm * bm * 4               # elementwise-tail temporaries (est.)
           + 8 * (bm + 16) * 128 * 4)      # small side / output tiles (padded)
    vmem_limit = int(min(max(2 * est, 32 * 1024 * 1024), 48 * 1024 * 1024))

    partials = pl.pallas_call(
        kernel,
        out_shape=jax.ShapeDtypeStruct((num_tiles, 1, bm), jnp.float32),
        grid_spec=grid_spec,
        compiler_params=pltpu.CompilerParams(
            # one independent output block per tile step -> shard the tile axis
            # across TensorCores (v7x megacore); K axis is a reduction.
            dimension_semantics=("parallel", "arbitrary"),
            vmem_limit_bytes=vmem_limit,
        ),
    )(blk_i, blk_j, emb_p, emb_t, sq_col, sq_row, lab_col, lab_row)

    # Pair count is a compile-time constant for the all-pairs selector.
    count = B * (B - 1) / 2.0
    return jnp.sum(partials) / count


def _reference_loss(embeddings, labels, margin=1.0):
    e = embeddings.astype(jnp.float32)
    B = e.shape[0]
    sq = jnp.sum(e * e, axis=1)
    d2 = jnp.maximum(sq[:, None] + sq[None, :] - 2.0 * (e @ e.T), 0.0)
    row = jnp.arange(B)[:, None]
    col = jnp.arange(B)[None, :]
    upper = row < col
    same = labels[:, None] == labels[None, :]
    pos = jnp.where(same & upper, d2, 0.0)
    neg = jnp.where((~same) & upper,
                    jnp.maximum(margin - jnp.sqrt(d2), 0.0) ** 2, 0.0)
    return (jnp.sum(pos) + jnp.sum(neg)) / (B * (B - 1) / 2.0)


if __name__ == "__main__":
    key = jax.random.PRNGKey(0)
    k1, k2, k3, k4, k5, k6 = jax.random.split(key, 6)

    # Case 1: tiny single-block batch (exercises B/D padding + diagonal mask).
    emb1 = jax.random.normal(k1, (10, 32), dtype=jnp.float32)
    lab1 = jax.random.randint(k2, (10,), 0, 3, dtype=jnp.int32)
    loss1 = online_contrastive_loss(emb1, lab1, margin=1.0)
    jax.block_until_ready(loss1)
    ref1 = _reference_loss(emb1, lab1, margin=1.0)
    assert jnp.allclose(loss1, ref1, rtol=1e-4, atol=1e-4), (loss1, ref1)

    # Case 2: multi-block triangular grid with padded last block, mask-free
    # interior blocks and a 2-step K accumulation (520 -> 5 blocks of 128,
    # D=200 -> 2 K-chunks of 128).
    emb2 = jax.random.normal(k3, (520, 200), dtype=jnp.float32)
    lab2 = jax.random.randint(k4, (520,), 0, 8, dtype=jnp.int32)
    loss2 = online_contrastive_loss(emb2, lab2, margin=0.5,
                                    block_rows=128, k_block=128)
    jax.block_until_ready(loss2)
    ref2 = _reference_loss(emb2, lab2, margin=0.5)
    assert jnp.allclose(loss2, ref2, rtol=1e-4, atol=1e-4), (loss2, ref2)

    # Case 3: bf16 MXU operands (f32 norms / f32 accumulation), looser tolerance.
    emb3 = jax.random.normal(k5, (64, 256), dtype=jnp.float32)
    lab3 = jax.random.randint(k6, (64,), 0, 4, dtype=jnp.int32)
    loss3 = online_contrastive_loss(emb3, lab3, margin=1.0,
                                    mxu_dtype=jnp.bfloat16)
    jax.block_until_ready(loss3)
    ref3 = _reference_loss(emb3, lab3, margin=1.0)
    assert jnp.allclose(loss3, ref3, rtol=2e-2, atol=2e-2), (loss3, ref3)

    print("KERNEL_OK")
</pallas_src>

<mosaic_0001>
module attributes {stable_mosaic.version = 11 : i64} {
  func.func @_online_contrastive_kernel(%arg0: i32, %arg1: i32, %arg2: memref<1xi32, #tpu.memory_space<smem>>, %arg3: memref<1xi32, #tpu.memory_space<smem>>, %arg4: memref<16x128xf32, #tpu.memory_space<vmem>>, %arg5: memref<128x16xf32, #tpu.memory_space<vmem>>, %arg6: memref<16x1xf32, #tpu.memory_space<vmem>>, %arg7: memref<1x16xf32, #tpu.memory_space<vmem>>, %arg8: memref<16x1xi32, #tpu.memory_space<vmem>>, %arg9: memref<1x16xi32, #tpu.memory_space<vmem>>, %arg10: memref<1x1x16xf32, #tpu.memory_space<vmem>>, %arg11: memref<16x16xf32, #tpu.memory_space<vmem>>) attributes {dimension_semantics = [#tpu.dimension_semantics<parallel>, #tpu.dimension_semantics<arbitrary>], iteration_bounds = array<i64: 1, 1>, scalar_prefetch = 2 : i64, scratch_operands = 1 : i64, tpu.core_type = #tpu.core_type<tc>, window_params = [{transform_indices = @transform_0, window_bounds = array<i64: 16, 128>}, {transform_indices = @transform_1, window_bounds = array<i64: 128, 16>}, {transform_indices = @transform_2, window_bounds = array<i64: 16, 1>}, {transform_indices = @transform_3, window_bounds = array<i64: 1, 16>}, {transform_indices = @transform_4, window_bounds = array<i64: 16, 1>}, {transform_indices = @transform_5, window_bounds = array<i64: 1, 16>}, {transform_indices = @transform_6, window_bounds = array<i64: 1, 1, 16>}]} {
    %c0_i32 = arith.constant 0 : i32
    %0 = arith.cmpi eq, %arg1, %c0_i32 : i32
    %1 = arith.extui %0 : i1 to i32
    %c0_i32_0 = arith.constant 0 : i32
    %2 = arith.cmpi ne, %1, %c0_i32_0 : i32
    scf.if %2 {
      %cst_10 = arith.constant 0.000000e+00 : f32
      %12 = vector.broadcast %cst_10 : f32 to vector<16x16xf32>
      %c0_11 = arith.constant 0 : index
      %c0_12 = arith.constant 0 : index
      %13 = vector.load %arg11[%c0_11, %c0_12] : memref<16x16xf32, #tpu.memory_space<vmem>>, vector<16x16xf32>
      tpu.vector_store %arg11[%c0_11, %c0_12], %12 {strides = array<i32>} : memref<16x16xf32, #tpu.memory_space<vmem>>, vector<16x16xf32>,
    } else {
    }
    %c0 = arith.constant 0 : index
    %c0_1 = arith.constant 0 : index
    %3 = vector.load %arg11[%c0, %c0_1] : memref<16x16xf32, #tpu.memory_space<vmem>>, vector<16x16xf32>
    %c0_2 = arith.constant 0 : index
    %c0_3 = arith.constant 0 : index
    %4 = vector.load %arg4[%c0_2, %c0_3] : memref<16x128xf32, #tpu.memory_space<vmem>>, vector<16x128xf32>
    %c0_4 = arith.constant 0 : index
    %c0_5 = arith.constant 0 : index
    %5 = vector.load %arg5[%c0_4, %c0_5] : memref<128x16xf32, #tpu.memory_space<vmem>>, vector<128x16xf32>
    %cst = arith.constant dense<0.000000e+00> : vector<16x16xf32>
    %6 = tpu.matmul %4, %5, %cst {dimension_numbers = #tpu.dot_dimension_numbers<[1], [0], [0], [1], [0, 0, 1, 1], [], []>} : vector<16x128xf32>, vector<128x16xf32>, vector<16x16xf32> -> vector<16x16xf32>
    %7 = arith.addf %3, %6 : vector<16x16xf32>
    %c0_6 = arith.constant 0 : index
    %c0_7 = arith.constant 0 : index
    %8 = vector.load %arg11[%c0_6, %c0_7] : memref<16x16xf32, #tpu.memory_space<vmem>>, vector<16x16xf32>
    tpu.vector_store %arg11[%c0_6, %c0_7], %7 {strides = array<i32>} : memref<16x16xf32, #tpu.memory_space<vmem>>, vector<16x16xf32>,
    %c0_i32_8 = arith.constant 0 : i32
    %9 = arith.cmpi eq, %arg1, %c0_i32_8 : i32
    %10 = arith.extui %9 : i1 to i32
    %c0_i32_9 = arith.constant 0 : i32
    %11 = arith.cmpi ne, %10, %c0_i32_9 : i32
    scf.if %11 {
      %c0_10 = arith.constant 0 : index
      %c0_11 = arith.constant 0 : index
      %12 = vector.load %arg11[%c0_10, %c0_11] : memref<16x16xf32, #tpu.memory_space<vmem>>, vector<16x16xf32>
      %c0_12 = arith.constant 0 : index
      %c0_13 = arith.constant 0 : index
      %13 = vector.load %arg6[%c0_12, %c0_13] : memref<16x1xf32, #tpu.memory_space<vmem>>, vector<16x1xf32>
      %c0_14 = arith.constant 0 : index
      %c0_15 = arith.constant 0 : index
      %14 = vector.load %arg7[%c0_14, %c0_15] : memref<1x16xf32, #tpu.memory_space<vmem>>, vector<1x16xf32>
      %15 = vector.broadcast %13 : vector<16x1xf32> to vector<16x16xf32>
      %16 = vector.broadcast %14 : vector<1x16xf32> to vector<16x16xf32>
      %17 = arith.addf %15, %16 : vector<16x16xf32>
      %cst_16 = arith.constant 2.000000e+00 : f32
      %18 = vector.broadcast %cst_16 : f32 to vector<16x16xf32>
      %19 = arith.mulf %18, %12 : vector<16x16xf32>
      %20 = arith.subf %17, %19 : vector<16x16xf32>
      %cst_17 = arith.constant 0.000000e+00 : f32
      %21 = vector.broadcast %cst_17 : f32 to vector<16x16xf32>
      %22 = arith.maximumf %20, %21 : vector<16x16xf32>
      %23 = math.sqrt %22 : vector<16x16xf32>
      %cst_18 = arith.constant 1.000000e+00 : f32
      %24 = vector.broadcast %cst_18 : f32 to vector<16x16xf32>
      %25 = arith.subf %24, %23 : vector<16x16xf32>
      %cst_19 = arith.constant 0.000000e+00 : f32
      %26 = vector.broadcast %cst_19 : f32 to vector<16x16xf32>
      %27 = arith.maximumf %25, %26 : vector<16x16xf32>
      %c0_20 = arith.constant 0 : index
      %c0_21 = arith.constant 0 : index
      %28 = vector.load %arg8[%c0_20, %c0_21] : memref<16x1xi32, #tpu.memory_space<vmem>>, vector<16x1xi32>
      %c0_22 = arith.constant 0 : index
      %c0_23 = arith.constant 0 : index
      %29 = vector.load %arg9[%c0_22, %c0_23] : memref<1x16xi32, #tpu.memory_space<vmem>>, vector<1x16xi32>
      %30 = vector.broadcast %28 : vector<16x1xi32> to vector<16x16xi32>
      %31 = vector.broadcast %29 : vector<1x16xi32> to vector<16x16xi32>
      %32 = arith.cmpi eq, %30, %31 : vector<16x16xi32>
      %33 = arith.mulf %27, %27 : vector<16x16xf32>
      %34 = arith.select %32, %22, %33 : vector<16x16xi1>, vector<16x16xf32>
      %35 = arith.index_cast %arg0 : i32 to index
      %36 = memref.load %arg2[%35] : memref<1xi32, #tpu.memory_space<smem>>
      %37 = arith.index_cast %arg0 : i32 to index
      %38 = memref.load %arg3[%37] : memref<1xi32, #tpu.memory_space<smem>>
      %39 = arith.cmpi eq, %36, %38 : i32
      %c0_i32_24 = arith.constant 0 : i32
      %40 = arith.cmpi eq, %38, %c0_i32_24 : i32
      %41 = arith.ori %39, %40 : i1
      %true = arith.constant true
      %42 = arith.xori %41, %true : i1
      %43 = arith.extui %42 : i1 to i32
      %c0_i32_25 = arith.constant 0 : i32
      %44 = arith.cmpi ne, %43, %c0_i32_25 : i32
      scf.if %44 {
        %cst_27 = arith.constant dense<0.000000e+00> : vector<16xf32>
        %47 = vector.multi_reduction <add>, %34, %cst_27 [0] : vector<16x16xf32> to vector<16xf32>
        %48 = vector.shape_cast %47 : vector<16xf32> to vector<1x16xf32>
        %49 = vector.shape_cast %48 : vector<1x16xf32> to vector<1x1x16xf32>
        %c0_28 = arith.constant 0 : index
        %c0_29 = arith.constant 0 : index
        %c0_30 = arith.constant 0 : index
        %50 = vector.load %arg10[%c0_28, %c0_29, %c0_30] : memref<1x1x16xf32, #tpu.memory_space<vmem>>, vector<1x1x16xf32>
        tpu.vector_store %arg10[%c0_28, %c0_29, %c0_30], %49 {strides = array<i32>} : memref<1x1x16xf32, #tpu.memory_space<vmem>>, vector<1x1x16xf32>,
      } else {
      }
      %45 = arith.extui %41 : i1 to i32
      %c0_i32_26 = arith.constant 0 : i32
      %46 = arith.cmpi ne, %45, %c0_i32_26 : i32
      scf.if %46 {
        %c16_i32 = arith.constant 16 : i32
        %47 = arith.muli %36, %c16_i32 : i32
        %48 = tpu.iota {dimensions = array<i32: 0>} : vector<16x16xi32>
        %49 = vector.broadcast %47 : i32 to vector<16x16xi32>
        %50 = arith.addi %49, %48 : vector<16x16xi32>
        %c16_i32_27 = arith.constant 16 : i32
        %51 = arith.muli %38, %c16_i32_27 : i32
        %52 = tpu.iota {dimensions = array<i32: 1>} : vector<16x16xi32>
        %53 = vector.broadcast %51 : i32 to vector<16x16xi32>
        %54 = arith.addi %53, %52 : vector<16x16xi32>
        %55 = arith.cmpi slt, %50, %54 : vector<16x16xi32>
        %c10_i32 = arith.constant 10 : i32
        %56 = vector.broadcast %c10_i32 : i32 to vector<16x16xi32>
        %57 = arith.cmpi slt, %54, %56 : vector<16x16xi32>
        %58 = arith.andi %55, %57 : vector<16x16xi1>
        %cst_28 = arith.constant 0.000000e+00 : f32
        %59 = vector.broadcast %cst_28 : f32 to vector<16x16xf32>
        %60 = arith.select %58, %34, %59 : vector<16x16xi1>, vector<16x16xf32>
        %cst_29 = arith.constant dense<0.000000e+00> : vector<16xf32>
        %61 = vector.multi_reduction <add>, %60, %cst_29 [0] : vector<16x16xf32> to vector<16xf32>
        %62 = vector.shape_cast %61 : vector<16xf32> to vector<1x16xf32>
        %63 = vector.shape_cast %62 : vector<1x16xf32> to vector<1x1x16xf32>
        %c0_30 = arith.constant 0 : index
        %c0_31 = arith.constant 0 : index
        %c0_32 = arith.constant 0 : index
        %64 = vector.load %arg10[%c0_30, %c0_31, %c0_32] : memref<1x1x16xf32, #tpu.memory_space<vmem>>, vector<1x1x16xf32>
        tpu.vector_store %arg10[%c0_30, %c0_31, %c0_32], %63 {strides = array<i32>} : memref<1x1x16xf32, #tpu.memory_space<vmem>>, vector<1x1x16xf32>,
      } else {
      }
    } else {
    }
    return
  }
  func.func @transform_0(%arg0: i32, %arg1: i32, %arg2: memref<1xi32, #tpu.memory_space<smem>>, %arg3: memref<1xi32, #tpu.memory_space<smem>>) -> (i32, i32) {
    %0 = arith.index_cast %arg0 : i32 to index
    %1 = memref.load %arg2[%0] : memref<1xi32, #tpu.memory_space<smem>>
    %c0_i32 = arith.constant 0 : i32
    return %1, %arg1 : i32, i32
  }
  func.func @transform_1(%arg0: i32, %arg1: i32, %arg2: memref<1xi32, #tpu.memory_space<smem>>, %arg3: memref<1xi32, #tpu.memory_space<smem>>) -> (i32, i32) {
    %0 = arith.index_cast %arg0 : i32 to index
    %1 = memref.load %arg3[%0] : memref<1xi32, #tpu.memory_space<smem>>
    %c0_i32 = arith.constant 0 : i32
    return %arg1, %1 : i32, i32
  }
  func.func @transform_2(%arg0: i32, %arg1: i32, %arg2: memref<1xi32, #tpu.memory_space<smem>>, %arg3: memref<1xi32, #tpu.memory_space<smem>>) -> (i32, i32) {
    %0 = arith.index_cast %arg0 : i32 to index
    %1 = memref.load %arg2[%0] : memref<1xi32, #tpu.memory_space<smem>>
    %c0_i32 = arith.constant 0 : i32
    %c0_i32_0 = arith.constant 0 : i32
    return %1, %c0_i32 : i32, i32
  }
  func.func @transform_3(%arg0: i32, %arg1: i32, %arg2: memref<1xi32, #tpu.memory_space<smem>>, %arg3: memref<1xi32, #tpu.memory_space<smem>>) -> (i32, i32) {
    %0 = arith.index_cast %arg0 : i32 to index
    %1 = memref.load %arg3[%0] : memref<1xi32, #tpu.memory_space<smem>>
    %c0_i32 = arith.constant 0 : i32
    %c0_i32_0 = arith.constant 0 : i32
    return %c0_i32, %1 : i32, i32
  }
  func.func @transform_4(%arg0: i32, %arg1: i32, %arg2: memref<1xi32, #tpu.memory_space<smem>>, %arg3: memref<1xi32, #tpu.memory_space<smem>>) -> (i32, i32) {
    %0 = arith.index_cast %arg0 : i32 to index
    %1 = memref.load %arg2[%0] : memref<1xi32, #tpu.memory_space<smem>>
    %c0_i32 = arith.constant 0 : i32
    %c0_i32_0 = arith.constant 0 : i32
    return %1, %c0_i32 : i32, i32
  }
  func.func @transform_5(%arg0: i32, %arg1: i32, %arg2: memref<1xi32, #tpu.memory_space<smem>>, %arg3: memref<1xi32, #tpu.memory_space<smem>>) -> (i32, i32) {
    %0 = arith.index_cast %arg0 : i32 to index
    %1 = memref.load %arg3[%0] : memref<1xi32, #tpu.memory_space<smem>>
    %c0_i32 = arith.constant 0 : i32
    %c0_i32_0 = arith.constant 0 : i32
    return %c0_i32, %1 : i32, i32
  }
  func.func @transform_6(%arg0: i32, %arg1: i32, %arg2: memref<1xi32, #tpu.memory_space<smem>>, %arg3: memref<1xi32, #tpu.memory_space<smem>>) -> (i32, i32, i32) {
    %c0_i32 = arith.constant 0 : i32
    %c0_i32_0 = arith.constant 0 : i32
    %c0_i32_1 = arith.constant 0 : i32
    return %arg0, %c0_i32, %c0_i32_0 : i32, i32, i32
  }
}

</mosaic_0001>

<bundles_post_ra>
// kernel: tpu_custom_call.1
= control target key start
LH: loop header
LB: loop body
LE: loop exit
PB: predicated region body
PF: predicated region fallthrough
CT: control target
= control target key end

     0   :  { %15 = vsyncpa [#allocation7], 0  ;;  %v427_v3 = vmov 0   ;;  %vm143_vm0 = vcmask 130048   ;;  %v428_v23 = vmov 0.0   ;;  %s574_s0 = inlined_call_operand.<no memory space> [shape: s32[1], index: 0, kind: input, shape index: {}]   ;;  %s575_s1 = inlined_call_operand.<no memory space> [shape: s32[1], index: 1, kind: input, shape index: {}]   ;;  %s576_s2 = inlined_call_operand.vmem [shape: f32[16,128], index: 2, kind: input, shape index: {}]   ;;  %s577_s3 = inlined_call_operand.vmem [shape: f32[128,16], index: 3, kind: input, shape index: {}]   ;;  %s578_s4 = inlined_call_operand.vmem [shape: f32[16,1], index: 4, kind: input, shape index: {}]   ;;  %s579_s5 = inlined_call_operand.vmem [shape: f32[1,16], index: 5, kind: input, shape index: {}]   ;;  %s580_s6 = inlined_call_operand.vmem [shape: s32[16,1], index: 6, kind: input, shape index: {}]   ;;  %s581_s7 = inlined_call_operand.vmem [shape: s32[1,16], index: 7, kind: input, shape index: {}]   ;;  %s582_s8 = inlined_call_operand.hbm [shape: f32[1,1,16], index: 8, kind: output, shape index: {}]  }
   0x1   :  { %p108_p0 = scmp.lt.s32.totalorder %s575_s1, 0  ;;  %s365_s9 = sshll.u32 %s574_s0, 1  ;;  %393 = vset.pattern.permute.xlu0 %v427_v3  ;;  %394 = vset.pattern.permute.xlu1 %v427_v3  ;;  %144 = vst.msk [vmem:[#allocation2] sm:$0xff] %vm143_vm0, %v428_v23 }
   0x2   :  { %p101_p1 = scmp.lt.s32.totalorder %s365_s9, 1  ;;  %p269_p2 = scmp.eq.s32.totalorder %s574_s0, %s575_s1  ;;  %145 = vst.msk [vmem:[#allocation2 + $0x8] sm:$0xff] %vm143_vm0, %v428_v23 }
   0x3   :  { %s484_s12 = scalar_select %p108_p0, %s575_s1, 0 }
   0x4   :  { %s585_s9 = smov (!%p101_p1, %s365_s9), 1  ;;  %p270_p3 = scmp.eq.s32.totalorder %s575_s1, 0 }
   0x5   :  { %s367_s13 = sshll.u32 %s484_s12, 3  ;;  %s124_s16 = scalar_lea.vmem %s579_s5, %s484_s12 }
   0x6   :  { %s494_s19 = scalar_lea.vmem %s577_s3, %s367_s13  ;;  %s499_s20 = sshll.u32 %s585_s9, 3  ;;  %v395_v31 = vld [vmem:[%s124_s16] ss:$0 sm:$0xff] }
   0x7   :  { %v165_v0 = vld [vmem:[%s494_s19 + $0x78] sm:$0xff]  ;;  %v164_v1 = vld [vmem:[%s494_s19 + $0x70] sm:$0xff]  ;;  %v163_v2 = vld [vmem:[%s494_s19 + $0x68] sm:$0xff]  ;;  %s118_s22 = scalar_lea.vmem %s578_s4, %s499_s20  ;;  %s131_s25 = scalar_lea.vmem %s580_s6, %s499_s20 }
   0x8   :  { %166 = vmatpush.msra.mxu0 %v165_v0  ;;  %374 = vmatpush.msra.mxu1 %v165_v0  ;;  %v162_v4 = vld [vmem:[%s494_s19 + $0x60] sm:$0xff]  ;;  %v161_v5 = vld [vmem:[%s494_s19 + $0x58] sm:$0xff]  ;;  %v160_v8 = vld [vmem:[%s494_s19 + $0x50] sm:$0xff]  ;;  %s104_s26 = scalar_lea.vmem %s576_s2, %s499_s20  ;;  %s137_s29 = scalar_lea.vmem %s581_s7, %s484_s12 }
   0x9   :  { %v199_v6 = vld [vmem:[%s118_s22] sm:$0xff]  ;;  %v159_v9 = vld [vmem:[%s494_s19 + $0x48] sm:$0xff]  ;;  %v157_v13 = vld [vmem:[%s494_s19 + $0x38] sm:$0xff]  ;;  %p539_p4 = por %p270_p3, %p269_p2 }
   0xa   :  { %167 = vmatpush.msra.mxu0 %v164_v1  ;;  %375 = vmatpush.msra.mxu1 %v164_v1  ;;  %v251_v7 = vld [vmem:[%s131_s25] sm:$0xff]  ;;  %v200_v11 = vld [vmem:[%s118_s22 + $0x8] sm:$0xff]  ;;  %v156_v14 = vld [vmem:[%s494_s19 + $0x30] sm:$0xff]  ;;  %s372_s20 = sshll.u32 (%p539_p4), %s574_s0, 4  ;;  %s373_s3 = sshll.u32 (%p539_p4), %s575_s1, 4  ;;  %vm303_vm12 = vcmask (%p539_p4), 122880  }
   0xb   :  { %204 = vperm.xlu0 %393, %v199_v6   ;;  %255 = vperm.xlu1 %394, %v251_v7   ;;  %v158_v10 = vld [vmem:[%s494_s19 + $0x40] sm:$0xff]  ;;  %v252_v12 = vld [vmem:[%s131_s25 + $0x8] sm:$0xff]  ;;  %v153_v17 = vld [vmem:[%s494_s19 + $0x18] sm:$0xff] }
   0xc   :  { %168 = vmatpush.msra.mxu0 %v163_v2  ;;  %376 = vmatpush.msra.mxu1 %v163_v2  ;;  %v155_v15 = vld [vmem:[%s494_s19 + $0x28] sm:$0xff]  ;;  %v154_v16 = vld [vmem:[%s494_s19 + $0x20] sm:$0xff]  ;;  %v152_v18 = vld [vmem:[%s494_s19 + $0x10] sm:$0xff] }
   0xd   :  { %v151_v19 = vld [vmem:[%s494_s19 + $0x8] sm:$0xff]  ;;  %v150_v20 = vld [vmem:[%s494_s19] sm:$0xff] }
   0xe   :  { %169 = vmatpush.msra.mxu0 %v162_v4  ;;  %377 = vmatpush.msra.mxu1 %v162_v4  ;;  %v148_v21 = vld [vmem:[%s104_s26] sm:$0xff]  ;;  %v149_v22 = vld [vmem:[%s104_s26 + $0x8] sm:$0xff] }
   0xf   :  { %v146_v24 = vld [vmem:[#allocation2] sm:$0xff]  ;;  %v147_v25 = vld [vmem:[#allocation2 + $0x8] sm:$0xff] }
  0x10   :  { %170 = vmatpush.msra.mxu0 %v161_v5  ;;  %378 = vmatpush.msra.mxu1 %v161_v5  ;;  %v396_v1 = vld [vmem:[%s137_s29] ss:$0 sm:$0xff] }
  0x12   :  { %171 = vmatpush.msra.mxu0 %v160_v8  ;;  %379 = vmatpush.msra.mxu1 %v160_v8 }
  0x13   :  { %209 = vperm.xlu0 %393, %v200_v11   ;;  %258 = vperm.xlu1 %394, %v252_v12   ;;  %v279_v11 = vstv (%p539_p4), %s372_s20  ;;  %v285_v12 = vstv (%p539_p4), %s373_s3 }
  0x14   :  { %172 = vmatpush.msra.mxu0 %v159_v9  ;;  %380 = vmatpush.msra.mxu1 %v159_v9 }
  0x16   :  { %173 = vmatpush.msra.mxu0 %v158_v10  ;;  %381 = vmatpush.msra.mxu1 %v158_v10  ;;  %v276_v10 = vlaneseq (%p539_p4) }
  0x18   :  { %174 = vmatpush.msra.mxu0 %v157_v13  ;;  %382 = vmatpush.msra.mxu1 %v157_v13  ;;  %v277_v13 = vshrl.u32 (%p539_p4), %v276_v10, 7 }
  0x1a   :  { %175 = vmatpush.msra.mxu0 %v156_v14  ;;  %383 = vmatpush.msra.mxu1 %v156_v14  ;;  %v284_v14 = vand.u32 (%p539_p4), 127, %v276_v10 }
  0x1c   :  { %176 = vmatpush.msra.mxu0 %v155_v15  ;;  %384 = vmatpush.msra.mxu1 %v155_v15  ;;  %v278_v15 = vadd.s32 (%p539_p4), 8, %v277_v13 }
  0x1e   :  { %177 = vmatpush.msra.mxu0 %v154_v16  ;;  %385 = vmatpush.msra.mxu1 %v154_v16  ;;  %v280_v16 = vadd.s32 (%p539_p4), %v279_v11, %v277_v13 }
  0x20   :  { %178 = vmatpush.msra.mxu0 %v153_v17  ;;  %386 = vmatpush.msra.mxu1 %v153_v17  ;;  %v286_v17 = vadd.s32 (%p539_p4), %v285_v12, %v284_v14 }
  0x22   :  { %179 = vmatpush.msra.mxu0 %v152_v18  ;;  %387 = vmatpush.msra.mxu1 %v152_v18  ;;  %v281_v18 = vadd.s32 (%p539_p4), %v279_v11, %v278_v15  ;;  %vm287_vm7 = vcmp.lt.s32.totalorder (%p539_p4), %v280_v16, %v286_v17  ;;  %vm289_vm8 = vcmp.lt.s32.totalorder (%p539_p4), %v286_v17, 10 }
  0x23   :  { %vm290_vm9 = vmand (%p539_p4), %vm287_vm7, %vm289_vm8 }
  0x24   :  { %180 = vmatpush.msra.mxu0 %v151_v19  ;;  %388 = vmatpush.msra.mxu1 %v151_v19  ;;  %vm288_vm10 = vcmp.lt.s32.totalorder (%p539_p4), %v281_v18, %v286_v17 }
  0x25   :  { %vm291_vm11 = vmand (%p539_p4), %vm288_vm10, %vm289_vm8 }
  0x26   :  { %181 = vmatpush.msra.mxu0 %v150_v20  ;;  %389 = vmatpush.msra.mxu1 %v150_v20 }
  0x27   :  { %182 = vmatmul.f32.vlgmr.msra.gmra.mxu0 %v148_v21  ;;  %185 = vmatmul.f32.vlgmr.msra.gmra.mxu1 %v149_v22 }
  0x7d   :  { %v205_v26 = vpop.permute.xlu0 %204  ;;  %v256_v52 = vpop.permute.xlu1 %255 }
  0x7e   :  { %v215_v34 = vadd.f32 %v395_v31, %v205_v26  ;;  %vm261_vm5 = vcmp.eq.s32.totalorder %v256_v52, %v396_v1 }
  0x85   :  { %v210_v32 = vpop.permute.xlu0 %209  ;;  %v259_v4 = vpop.permute.xlu1 %258 }
  0x86   :  { %v216_v37 = vadd.f32 %v395_v31, %v210_v32  ;;  %vm262_vm6 = vcmp.eq.s32.totalorder %v259_v4, %v396_v1 }
  0xa4   :  { %v183_v27 = vpop.f32.mrf.mxu0  ;;  %v186_v28 = vpop.f32.mrf.mxu1 }
  0xa5   :  { %v189_v29 = vadd.f32 %v183_v27, %v146_v24  ;;  %v190_v30 = vadd.f32 %v186_v28, %v147_v25 }
  0xa7   :  { %192 = vst.msk [vmem:[#allocation2] sm:$0xff] %vm143_vm0, %v189_v29 }
  0xa8   :  { %193 = vst.msk [vmem:[#allocation2 + $0x8] sm:$0xff] %vm143_vm0, %v190_v30 }
  0xae   :  { %v197_v33 = vld [vmem:[#allocation2] sm:$0xff] }
  0xaf   :  { %v198_v35 = vld [vmem:[#allocation2 + $0x8] sm:$0xff]  ;;  %v217_v36 = vmul.f32 2.0, %v197_v33 }
  0xb0   :  { %v218_v38 = vmul.f32 2.0, %v198_v35 }
  0xb1   :  { %v219_v39 = vsub.f32 %v215_v34, %v217_v36 }
  0xb2   :  { %v220_v40 = vsub.f32 %v216_v37, %v218_v38 }
  0xb3   :  { %v221_v41 = vmax.f32 %v219_v39, 0.0 }
  0xb4   :  { %v222_v42 = vmax.f32 %v220_v40, 0.0 }
  0xb5   :  { %397 = vrsqrt.f32 %v221_v41  ;;  %vm230_vm1 = vcmp.eq.f32.partialorder %v221_v41, inf  ;;  %v233_v57 = vand.u32 2147483648, %v221_v41  ;;  %vm232_vm2 = vcmp.eq.f32.partialorder %v221_v41, 0.0 }
  0xb6   :  { %399 = vrsqrt.f32 %v222_v42  ;;  %vm242_vm3 = vcmp.eq.f32.partialorder %v222_v42, inf  ;;  %v245_v60 = vand.u32 2147483648, %v222_v42  ;;  %vm244_vm4 = vcmp.eq.f32.partialorder %v222_v42, 0.0 }
  0xbb   :  { %v398_v43 = vpop.eup %397 }
  0xbc   :  { %v400_v44 = vpop.eup %399  ;;  %v224_v45 = vmul.f32 %v398_v43, %v221_v41 }
  0xbd   :  { %v236_v46 = vmul.f32 %v400_v44, %v222_v42 }
  0xbe   :  { %v225_v47 = vmul.f32 %v398_v43, %v224_v45 }
  0xbf   :  { %v237_v48 = vmul.f32 %v400_v44, %v236_v46 }
  0xc0   :  { %v226_v49 = vmul.f32 0.5, %v225_v47 }
  0xc1   :  { %v238_v50 = vmul.f32 0.5, %v237_v48 }
  0xc2   :  { %v227_v51 = vsub.f32 1.5, %v226_v49 }
  0xc3   :  { %v239_v53 = vsub.f32 1.5, %v238_v50 }
  0xc4   :  { %v228_v54 = vmul.f32 %v398_v43, %v227_v51 }
  0xc5   :  { %v240_v55 = vmul.f32 %v400_v44, %v239_v53 }
  0xc6   :  { %v229_v56 = vmul.f32 %v228_v54, %v221_v41 }
  0xc7   :  { %v241_v58 = vmul.f32 %v240_v55, %v222_v42 }
  0xc8   :  { %v231_v59 = vsel %vm230_vm1, %v221_v41, %v229_v56 }
  0xc9   :  { %v234_v61 = vsel %vm232_vm2, %v233_v57, %v231_v59  ;;  %v243_v62 = vsel %vm242_vm3, %v222_v42, %v241_v58 }
  0xca   :  { %v247_v63 = vsub.f32 1.0, %v234_v61  ;;  %v246_v0 = vsel %vm244_vm4, %v245_v60, %v243_v62 }
  0xcb   :  { %v248_v2 = vsub.f32 1.0, %v246_v0 }
  0xcc   :  { %v249_v3 = vmax.f32 %v247_v63, 0.0 }
  0xcd   :  { %v250_v5 = vmax.f32 %v248_v2, 0.0  ;;  %274 = sbr.rel (!%p539_p4) target bundleno = 227 (0xe3), region = 37 }
  0xce   :  { %v263_v6 = vmul.f32 %v249_v3, %v249_v3 }
  0xcf   :  { %v264_v7 = vmul.f32 %v250_v5, %v250_v5 }
  0xd0   :  { %v265_v8 = vsel %vm261_vm5, %v221_v41, %v263_v6 }
  0xd1   :  { %v266_v9 = vsel %vm262_vm6, %v222_v42, %v264_v7  ;;  %v292_v19 = vsel (%p539_p4), %vm290_vm9, %v265_v8, 0.0 }
  0xd2   :  { %v294_v20 = vsel %vm143_vm0, %v292_v19, 0.0  ;;  %v293_v21 = vsel %vm291_vm11, %v266_v9, 0.0 }
  0xd3   :  { %v295_v22 = vsel %vm143_vm0, %v293_v21, 0.0 }
  0xd4   :  { %v296_v23 = vadd.f32 %v295_v22, %v294_v20 }
  0xd6   :  { %v297_v24 = vrot.slane %v296_v23, 4 }
  0xd8   :  { %v298_v25 = vadd.f32 %v297_v24, %v296_v23 }
  0xda   :  { %v299_v26 = vrot.slane %v298_v25, 2 }
  0xdc   :  { %v300_v27 = vadd.f32 %v299_v26, %v298_v25 }
  0xde   :  { %v301_v28 = vrot.slane %v300_v27, 1 }
  0xe0   :  { %v302_v29 = vadd.f32 %v301_v28, %v300_v27 }
  0xe2   :  { %304 = vst.msk [vmem:[#allocation6] sm:$0x1] %vm303_vm12, %v302_v29 }
  0xe3 PF:  { %307 = sbr.rel (%p539_p4) target bundleno = 248 (0xf8), region = 41 }
  0xe8   :  { %v308_v30 = vsel %vm143_vm0, %v265_v8, 0.0  ;;  %v309_v31 = vsel %vm143_vm0, %v266_v9, 0.0  ;;  %vm317_vm13 = vcmask 122880  }
  0xe9   :  { %v310_v32 = vadd.f32 %v309_v31, %v308_v30 }
  0xeb   :  { %v311_v33 = vrot.slane %v310_v32, 4 }
  0xed   :  { %v312_v34 = vadd.f32 %v311_v33, %v310_v32 }
  0xef   :  { %v313_v35 = vrot.slane %v312_v34, 2 }
  0xf1   :  { %v314_v36 = vadd.f32 %v313_v35, %v312_v34 }
  0xf3   :  { %v315_v37 = vrot.slane %v314_v36, 1 }
  0xf5   :  { %v316_v38 = vadd.f32 %v315_v37, %v314_v36 }
  0xf7   :  { %318 = vst.msk [vmem:[#allocation6] sm:$0x1] %vm317_vm13, %v316_v38 }
  0xf8 PF:  { %s326_s21 = sshll.u32 %s582_s8, 4  ;;  %s429_s22 = smov [#allocation6]   ;;  %s327_s21 = int_to_ptr.hbm [resolvable:$true] %s326_s21 }
  0xf9   :  { %s324_s23 = sshll.u32 %s429_s22, 4  ;;  %s325_s23 = int_to_ptr.vmem [resolvable:$true] %s324_s23 }
  0xfa   :  { %329 = dma.vmem_to_hbm [thread:$0]  %s325_s23, 16, %s327_s21, [#allocation7]  }
  0xfb   :  { %425 = dma.done.wait [#allocation7], 16  }
  0xfc   :  { %426 = vsyncadd [#allocation7], 4294967280 }
  0xfd   :  { %334 = vsyncpa [#allocation7], 1 }

</bundles_post_ra>
